<compile_context>
chip_gen: v5e
topology: v5e:2x2
jax: 0.10.0
libtpu: 0.0.40
codegen_flags: <defaults>
</compile_context>

<pallas_src>
import functools

import jax
import jax.numpy as jnp
from jax.experimental import pallas as pl
from jax.experimental.pallas import tpu as pltpu


def _focal_loss_kernel(x_ref, t_ref, out_ref, acc_ref, *, gamma, valid_cols):
    """One (batch-element, spatial-tile) step.

    x_ref:   (1, C, T) logits tile, native dtype (classes on sublanes).
    t_ref:   (1, 1, T) int32 target class ids.
    out_ref: (1, 1, 1) f32 per-batch-element partial loss sum.
    acc_ref: (1, T)    f32 lane-parallel accumulator scratch.
    """
    j = pl.program_id(1)

    @pl.when(j == 0)
    def _init():
        acc_ref[...] = jnp.zeros_like(acc_ref)

    x = x_ref[0].astype(jnp.float32)          # (C, T)
    tgt = t_ref[0]                            # (1, T) int32
    c, tcols = x.shape

    # Numerically-stable log-softmax over the class (sublane) axis.
    m = jnp.max(x, axis=0, keepdims=True)                     # (1, T)
    z = x - m                                                  # (C, T)
    lse = jnp.log(jnp.sum(jnp.exp(z), axis=0, keepdims=True))  # (1, T)

    # Gather log-prob of the target class via a one-hot sublane mask.
    cls = jax.lax.broadcasted_iota(jnp.int32, (c, tcols), 0)   # (C, T)
    logpt = jnp.sum(jnp.where(cls == tgt, z, 0.0), axis=0, keepdims=True) - lse

    pt = jnp.exp(logpt)

    # Focal modulation; gamma is static, so special-case cheap forms.
    if gamma == 0.0:
        loss = -logpt
    else:
        w = 1.0 - pt
        if float(gamma).is_integer() and 1 <= int(gamma) <= 4:
            f = w
            for _ in range(int(gamma) - 1):
                f = f * w
        else:
            f = w ** gamma
        loss = -f * logpt                                      # (1, T)

    # Mask out spatial-padding columns beyond the true extent.
    col = j * tcols + jax.lax.broadcasted_iota(jnp.int32, (1, tcols), 1)
    loss = jnp.where(col < valid_cols, loss, 0.0)

    acc_ref[...] += loss

    @pl.when(j == pl.num_programs(1) - 1)
    def _finalize():
        out_ref[...] = jnp.sum(acc_ref[...]).reshape(1, 1, 1)


def _pick_block_cols(hw128, cap_cols):
    """Largest multiple of 128 that divides hw128 and is <= cap_cols.

    Falls back to a non-dividing tile (caller pads) only if the best divisor
    is degenerately small.
    """
    q = hw128 // 128
    max_d = max(1, cap_cols // 128)
    best = 1
    for d in range(1, min(q, max_d) + 1):
        if q % d == 0:
            best = d
    t = best * 128
    if t < 512 and hw128 > cap_cols:
        t = min(cap_cols, hw128)
    return t


def focal_loss(logits, target, gamma=0.0, size_average=True,
               max_block_bytes=1 << 20):
    """Pallas implementation of FocalLoss.forward (returns a scalar)."""
    if logits.ndim > 2:
        n, c = logits.shape[0], logits.shape[1]
        x = logits.reshape(n, c, -1)              # (N, C, HW) — free reshape
        tgt = target.reshape(n, -1)               # (N, HW)
    else:
        # dim == 2 branch of the module: (M, C) rows.  Put classes on sublanes
        # and rows on lanes (one small transpose in the wrapper).
        c = logits.shape[1]
        n = 1
        x = logits.T.reshape(1, c, -1)            # (1, C, M)
        tgt = target.reshape(1, -1)
    hw = x.shape[2]

    itemsize = jnp.dtype(x.dtype).itemsize
    hw128 = ((hw + 127) // 128) * 128
    cap_cols = max(128, (max_block_bytes // (c * itemsize)) // 128 * 128)
    t_block = _pick_block_cols(hw128, cap_cols)
    hw_pad = ((hw + t_block - 1) // t_block) * t_block

    if hw_pad != hw:
        x = jnp.pad(x, ((0, 0), (0, 0), (0, hw_pad - hw)))
        tgt = jnp.pad(tgt, ((0, 0), (0, hw_pad - hw)))
    tgt = tgt.reshape(n, 1, hw_pad).astype(jnp.int32)

    grid = (n, hw_pad // t_block)
    kernel = functools.partial(_focal_loss_kernel,
                               gamma=float(gamma),
                               valid_cols=int(hw))

    partials = pl.pallas_call(
        kernel,
        out_shape=jax.ShapeDtypeStruct((n, 1, 1), jnp.float32),
        grid_spec=pltpu.PrefetchScalarGridSpec(
            num_scalar_prefetch=0,
            grid=grid,
            in_specs=[
                pl.BlockSpec((1, c, t_block), lambda i, j: (i, 0, j)),
                pl.BlockSpec((1, 1, t_block), lambda i, j: (i, 0, j)),
            ],
            out_specs=pl.BlockSpec((1, 1, 1), lambda i, j: (i, 0, 0)),
            scratch_shapes=[pltpu.VMEM((1, t_block), jnp.float32)],
        ),
        compiler_params=pltpu.CompilerParams(
            dimension_semantics=("parallel", "arbitrary")),
    )(x, tgt)

    total = jnp.sum(partials)
    if size_average:
        total = total / float(n * hw)
    return total


def _focal_loss_ref(logits, target, gamma=0.0, size_average=True):
    """Pure-JAX reference mirroring the PyTorch module exactly."""
    if logits.ndim > 2:
        n, c = logits.shape[0], logits.shape[1]
        logits = logits.reshape(n, c, -1).transpose(0, 2, 1).reshape(-1, c)
    target = target.reshape(-1)
    logsm = jax.nn.log_softmax(logits.astype(jnp.float32), axis=1)
    logpt = jnp.take_along_axis(
        logsm, target[:, None].astype(jnp.int32), axis=1)[:, 0]
    pt = jnp.exp(logpt)
    loss = -((1.0 - pt) ** gamma) * logpt
    return loss.mean() if size_average else loss.sum()


if __name__ == "__main__":
    key = jax.random.PRNGKey(0)
    kx, kt = jax.random.split(key)

    # NCHW logits, as the PyTorch forward expects for the dim > 2 branch.
    N, C, H, W = 2, 4, 16, 16
    x = jax.random.normal(kx, (N, C, H, W), dtype=jnp.float32)
    target = jax.random.randint(kt, (N, H, W), 0, C, dtype=jnp.int32)

    for gamma, size_average in [(2.0, True), (0.0, True), (2.0, False), (0.5, True)]:
        out = jax.block_until_ready(
            focal_loss(x, target, gamma=gamma, size_average=size_average))
        ref = _focal_loss_ref(x, target, gamma=gamma, size_average=size_average)
        assert jnp.allclose(out, ref, rtol=1e-5, atol=1e-5), \
            (gamma, size_average, out, ref)

    # Ragged spatial extent (HW not a multiple of 128): padding + masking path.
    H2, W2 = 15, 15
    x2 = jax.random.normal(kx, (N, C, H2, W2), dtype=jnp.float32)
    t2 = jax.random.randint(kt, (N, H2, W2), 0, C, dtype=jnp.int32)
    out2 = jax.block_until_ready(focal_loss(x2, t2, gamma=2.0))
    ref2 = _focal_loss_ref(x2, t2, gamma=2.0)
    assert jnp.allclose(out2, ref2, rtol=1e-5, atol=1e-5), (out2, ref2)

    # Already-flat (M, C) inputs (the dim == 2 branch of the module).
    M = 40
    x3 = jax.random.normal(kx, (M, C), dtype=jnp.float32)
    t3 = jax.random.randint(kt, (M,), 0, C, dtype=jnp.int32)
    out3 = jax.block_until_ready(focal_loss(x3, t3, gamma=2.0))
    ref3 = _focal_loss_ref(x3, t3, gamma=2.0)
    assert jnp.allclose(out3, ref3, rtol=1e-5, atol=1e-5), (out3, ref3)

    # bf16 logits flow straight into the kernel (no wrapper upcast).
    xb = x.astype(jnp.bfloat16)
    outb = jax.block_until_ready(focal_loss(xb, target, gamma=2.0))
    refb = _focal_loss_ref(xb, target, gamma=2.0)
    assert jnp.allclose(outb, refb, rtol=1e-4, atol=1e-4), (outb, refb)

    print("KERNEL_OK")
</pallas_src>

<mosaic_0001>
module attributes {stable_mosaic.version = 11 : i64} {
  func.func @_focal_loss_kernel(%arg0: i32, %arg1: i32, %arg2: memref<1x4x256xf32, #tpu.memory_space<vmem>>, %arg3: memref<1x1x256xi32, #tpu.memory_space<vmem>>, %arg4: memref<1x1x1xf32, #tpu.memory_space<vmem>>, %arg5: memref<1x256xf32, #tpu.memory_space<vmem>>) attributes {dimension_semantics = [#tpu.dimension_semantics<parallel>, #tpu.dimension_semantics<arbitrary>], iteration_bounds = array<i64: 2, 1>, scalar_prefetch = 0 : i64, scratch_operands = 1 : i64, tpu.core_type = #tpu.core_type<tc>, window_params = [{transform_indices = @transform_0, window_bounds = array<i64: 1, 4, 256>}, {transform_indices = @transform_1, window_bounds = array<i64: 1, 1, 256>}, {transform_indices = @transform_2, window_bounds = array<i64: 1, 1, 1>}]} {
    %c0_i32 = arith.constant 0 : i32
    %0 = arith.cmpi eq, %arg1, %c0_i32 : i32
    %1 = arith.extui %0 : i1 to i32
    %c0_i32_0 = arith.constant 0 : i32
    %2 = arith.cmpi ne, %1, %c0_i32_0 : i32
    scf.if %2 {
      %cst_19 = arith.constant 0.000000e+00 : f32
      %44 = vector.broadcast %cst_19 : f32 to vector<1x256xf32>
      %c0_20 = arith.constant 0 : index
      %c0_21 = arith.constant 0 : index
      %45 = vector.load %arg5[%c0_20, %c0_21] : memref<1x256xf32, #tpu.memory_space<vmem>>, vector<1x256xf32>
      tpu.vector_store %arg5[%c0_20, %c0_21], %44 {strides = array<i32>} : memref<1x256xf32, #tpu.memory_space<vmem>>, vector<1x256xf32>,
    } else {
    }
    %c0 = arith.constant 0 : index
    %c0_1 = arith.constant 0 : index
    %c0_2 = arith.constant 0 : index
    %3 = vector.load %arg2[%c0, %c0_1, %c0_2] : memref<1x4x256xf32, #tpu.memory_space<vmem>>, vector<1x4x256xf32>
    %4 = vector.shape_cast %3 : vector<1x4x256xf32> to vector<4x256xf32>
    %c0_3 = arith.constant 0 : index
    %c0_4 = arith.constant 0 : index
    %c0_5 = arith.constant 0 : index
    %5 = vector.load %arg3[%c0_3, %c0_4, %c0_5] : memref<1x1x256xi32, #tpu.memory_space<vmem>>, vector<1x1x256xi32>
    %6 = vector.shape_cast %5 : vector<1x1x256xi32> to vector<1x256xi32>
    %cst = arith.constant dense<0xFF800000> : vector<256xf32>
    %7 = vector.multi_reduction <maximumf>, %4, %cst [0] : vector<4x256xf32> to vector<256xf32>
    %8 = vector.shape_cast %7 : vector<256xf32> to vector<1x256xf32>
    %9 = vector.broadcast %8 : vector<1x256xf32> to vector<4x256xf32>
    %10 = arith.subf %4, %9 : vector<4x256xf32>
    %11 = math.exp %10 : vector<4x256xf32>
    %cst_6 = arith.constant dense<0.000000e+00> : vector<256xf32>
    %12 = vector.multi_reduction <add>, %11, %cst_6 [0] : vector<4x256xf32> to vector<256xf32>
    %13 = vector.shape_cast %12 : vector<256xf32> to vector<1x256xf32>
    %14 = math.log %13 : vector<1x256xf32>
    %15 = tpu.iota {dimensions = array<i32: 0>} : vector<4x256xi32>
    %16 = vector.broadcast %6 : vector<1x256xi32> to vector<4x256xi32>
    %17 = arith.cmpi eq, %15, %16 : vector<4x256xi32>
    %cst_7 = arith.constant 0.000000e+00 : f32
    %18 = vector.broadcast %cst_7 : f32 to vector<4x256xf32>
    %19 = arith.select %17, %10, %18 : vector<4x256xi1>, vector<4x256xf32>
    %cst_8 = arith.constant dense<0.000000e+00> : vector<256xf32>
    %20 = vector.multi_reduction <add>, %19, %cst_8 [0] : vector<4x256xf32> to vector<256xf32>
    %21 = vector.shape_cast %20 : vector<256xf32> to vector<1x256xf32>
    %22 = arith.subf %21, %14 : vector<1x256xf32>
    %23 = math.exp %22 : vector<1x256xf32>
    %cst_9 = arith.constant 1.000000e+00 : f32
    %24 = vector.broadcast %cst_9 : f32 to vector<1x256xf32>
    %25 = arith.subf %24, %23 : vector<1x256xf32>
    %26 = arith.mulf %25, %25 : vector<1x256xf32>
    %cst_10 = arith.constant 0.000000e+00 : f32
    %27 = vector.broadcast %cst_10 : f32 to vector<1x256xf32>
    %28 = arith.subf %27, %26 : vector<1x256xf32>
    %29 = arith.mulf %28, %22 : vector<1x256xf32>
    %c256_i32 = arith.constant 256 : i32
    %30 = arith.muli %arg1, %c256_i32 : i32
    %31 = tpu.iota {dimensions = array<i32: 1>} : vector<1x256xi32>
    %32 = vector.broadcast %30 : i32 to vector<1x256xi32>
    %33 = arith.addi %32, %31 : vector<1x256xi32>
    %c256_i32_11 = arith.constant 256 : i32
    %34 = vector.broadcast %c256_i32_11 : i32 to vector<1x256xi32>
    %35 = arith.cmpi slt, %33, %34 : vector<1x256xi32>
    %cst_12 = arith.constant 0.000000e+00 : f32
    %36 = vector.broadcast %cst_12 : f32 to vector<1x256xf32>
    %37 = arith.select %35, %29, %36 : vector<1x256xi1>, vector<1x256xf32>
    %c0_13 = arith.constant 0 : index
    %c0_14 = arith.constant 0 : index
    %38 = vector.load %arg5[%c0_13, %c0_14] : memref<1x256xf32, #tpu.memory_space<vmem>>, vector<1x256xf32>
    %39 = arith.addf %38, %37 : vector<1x256xf32>
    %c0_15 = arith.constant 0 : index
    %c0_16 = arith.constant 0 : index
    %40 = vector.load %arg5[%c0_15, %c0_16] : memref<1x256xf32, #tpu.memory_space<vmem>>, vector<1x256xf32>
    tpu.vector_store %arg5[%c0_15, %c0_16], %39 {strides = array<i32>} : memref<1x256xf32, #tpu.memory_space<vmem>>, vector<1x256xf32>,
    %c0_i32_17 = arith.constant 0 : i32
    %41 = arith.cmpi eq, %arg1, %c0_i32_17 : i32
    %42 = arith.extui %41 : i1 to i32
    %c0_i32_18 = arith.constant 0 : i32
    %43 = arith.cmpi ne, %42, %c0_i32_18 : i32
    scf.if %43 {
      %c0_19 = arith.constant 0 : index
      %c0_20 = arith.constant 0 : index
      %44 = vector.load %arg5[%c0_19, %c0_20] : memref<1x256xf32, #tpu.memory_space<vmem>>, vector<1x256xf32>
      %45 = vector.shape_cast %44 : vector<1x256xf32> to vector<1x1x256xf32>
      %cst_21 = arith.constant dense<0.000000e+00> : vector<1xf32>
      %46 = vector.multi_reduction <add>, %45, %cst_21 [1, 2] : vector<1x1x256xf32> to vector<1xf32>
      %47 = vector.shape_cast %46 : vector<1xf32> to vector<1x1x1xf32>
      %48 = vector.extract %47[0, 0, 0] : f32 from vector<1x1x1xf32>
      %49 = vector.broadcast %48 : f32 to vector<1x1x1xf32>
      %c0_22 = arith.constant 0 : index
      %c0_23 = arith.constant 0 : index
      %c0_24 = arith.constant 0 : index
      %50 = vector.load %arg4[%c0_22, %c0_23, %c0_24] : memref<1x1x1xf32, #tpu.memory_space<vmem>>, vector<1x1x1xf32>
      tpu.vector_store %arg4[%c0_22, %c0_23, %c0_24], %49 {strides = array<i32>} : memref<1x1x1xf32, #tpu.memory_space<vmem>>, vector<1x1x1xf32>,
    } else {
    }
    return
  }
  func.func @transform_0(%arg0: i32, %arg1: i32) -> (i32, i32, i32) {
    %c0_i32 = arith.constant 0 : i32
    %c0_i32_0 = arith.constant 0 : i32
    return %arg0, %c0_i32, %arg1 : i32, i32, i32
  }
  func.func @transform_1(%arg0: i32, %arg1: i32) -> (i32, i32, i32) {
    %c0_i32 = arith.constant 0 : i32
    %c0_i32_0 = arith.constant 0 : i32
    return %arg0, %c0_i32, %arg1 : i32, i32, i32
  }
  func.func @transform_2(%arg0: i32, %arg1: i32) -> (i32, i32, i32) {
    %c0_i32 = arith.constant 0 : i32
    %c0_i32_0 = arith.constant 0 : i32
    %c0_i32_1 = arith.constant 0 : i32
    return %arg0, %c0_i32, %c0_i32_0 : i32, i32, i32
  }
}

</mosaic_0001>

<bundles_post_ra>
// kernel: tpu_custom_call.1
= control target key start
LH: loop header
LB: loop body
LE: loop exit
PB: predicated region body
PF: predicated region fallthrough
CT: control target
= control target key end

     0   :  { %7 = vsyncpa [#allocation4], 0  ;;  %s812_s0 = inlined_call_operand.hbm [shape: f32[2,4,256], index: 0, kind: input, shape index: {}]   ;;  %s813_s1 = inlined_call_operand.hbm [shape: s32[2,1,256], index: 1, kind: input, shape index: {}]   ;;  %s814_s2 = inlined_call_operand.vmem [shape: f32[2,1,1], index: 2, kind: output, shape index: {}]  }
   0x1   :  { %9 = vsyncpa [#allocation4 + $0x1], 0 }
   0x2   :  { %10 = vsyncpa [#allocation6], 0 }
   0x3   :  { %12 = vsyncpa [#allocation6 + $0x1], 0  ;;  %s690_s9 = smov 0   ;;  %s692_s10 = smov 0  }
   0x4   :  { %s694_s11 = smov 0   ;;  %s696_s12 = smov 0  }
   0x5   :  { %s698_s13 = smov 0   ;;  %s700_s14 = smov 0  }
   0x6 LB: > { %s470_s15 = sadd.s32 4294967295, %s672_s14   ;;  %s30_s16 = sadd.s32 1, %s668_s13  ;;  %s672_s14 = sphi %s700_s14, %s18_s14   ;;  %s668_s13 = sphi %s698_s13, %s824_s13   ;;  %s664_s12 = sphi %s696_s12, %s823_s12   ;;  %s660_s11 = sphi %s694_s11, %s822_s11   ;;  %s656_s10 = sphi %s692_s10, %s821_s10   ;;  %s652_s9 = sphi %s690_s9, %s820_s9  }
   0x7   : > { %p32_p0 = scmp.ge.s32.totalorder %s30_s16, 2  ;;  %s39_s17 = sadd.s32 1, %s660_s11 }
   0x8   : > { %p46_p1 = scmp.ne.s32.totalorder %s660_s11, %s656_s10  ;;  %p47_p2 = scmp.eq.s32.totalorder %s672_s14, 0 }
   0x9   : > { %s826_s16 = smov (%p32_p0, %s30_s16), 0  ;;  %p52_p4 = scmp.ne.s32.totalorder %s656_s10, %s652_s9 }
   0xa   : > { %p726_p3 = por %p47_p2, %p46_p1  ;;  %s34_s19 = ssub.s32 %s668_s13, %s826_s16 }
   0xb   : > { %p53_p5 = scmp.eq.s32.totalorder %s470_s15, 0  ;;  %p37_p6 = scmp.eq.s32.totalorder %s34_s19, 0 }
   0xc   : > { %p498_p8 = scmp.lt.s32.totalorder %s672_s14, 2  ;;  %s130_s22 = sand.u32 1, %s660_s11  }
   0xd   : > { %p733_p7 = por %p53_p5, %p52_p4  ;;  %s484_s23 = sshll.u32 %s668_s13, 3 }
   0xe   : > { %s739_s21 = scalar_select %p37_p6, %s660_s11, %s39_s17  }
   0xf   : > { %s474_s24 = sshll.u32 %s130_s22, 3  ;;  %s141_s27 = scalar_lea.hbm %s812_s0, %s484_s23 }
  0x10   : > { %s143_s28 = sshll.u32 %s141_s27, 4  ;;  %s134_s29 = scalar_lea.vmem [#allocation3], %s474_s24  ;;  %s144_s28 = int_to_ptr.hbm [resolvable:$true] %s143_s28 }
  0x11   : > { %s145_s30 = sshll.u32 %s134_s29, 4  ;;  %p748_p9 = pnand %p498_p8, %p726_p3  ;;  %s146_s30 = int_to_ptr.vmem [resolvable:$true] %s145_s30 }
  0x12   : > { %p479_p10 = scmp.ge.s32.totalorder %s672_s14, 1  ;;  %p171_p11 = scmp.lt.s32.totalorder %s672_s14, 3 }
  0x13   : > { %s477_s4 = sshll.u32 %s130_s22, 1  ;;  %s131_s5 = scalar_lea.sflag [#allocation4], %s130_s22 }
  0x14   : > { %494 = dma.hbm_to_vmem [thread:$0]  (!%p748_p9), %s144_s28, 128, %s146_s30, %s131_s5  }
  0x15   : > { %p172_p12 = pnand %p479_p10, %p171_p11  ;;  %s478_s6 = sshll.u32 %s668_s13, 1 }
  0x16   : > { %s156_s7 = scalar_lea.vmem [#allocation5], %s477_s4  ;;  %s162_s17 = scalar_lea.hbm %s813_s1, %s478_s6 }
  0x17   : > { %s166_s8 = sshll.u32 %s156_s7, 4  ;;  %s164_s18 = sshll.u32 %s162_s17, 4  ;;  %s167_s8 = int_to_ptr.vmem [resolvable:$true] %s166_s8  ;;  %s165_s18 = int_to_ptr.hbm [resolvable:$true] %s164_s18 }
  0x18   : > { %s153_s19 = scalar_lea.sflag [#allocation6], %s130_s22  ;;  %175 = sbr.rel (%p172_p12) target bundleno = 317 (0x13d), region = 28 }
  0x19   : > { %497 = dma.hbm_to_vmem [thread:$0]  (!%p748_p9), %s165_s18, 32, %s167_s8, %s153_s19  }
  0x1a   : > { %s177_s23 = sand.u32 (!%p172_p12), 1, %s656_s10  }
  0x1b   : > { %s480_s24 = sshll.u32 (!%p172_p12), %s177_s23, 3  ;;  %s178_s25 = scalar_lea.sflag (!%p172_p12), [#allocation4], %s177_s23 }
  0x1c   : > { %s181_s26 = scalar_lea.vmem (!%p172_p12), [#allocation3], %s480_s24 }
  0x1d   : > { %643 = dma.done.wait (%p733_p7), %s178_s25, 128  }
  0x1e   : > { %645 = vsyncadd (%p733_p7), %s178_s25, 4294967168  ;;  %s481_s27 = sshll.u32 %s177_s23, 1  ;;  %s188_s28 = scalar_lea.sflag [#allocation6], %s177_s23 }
  0x1f   : > { %s767_s29 = scalar_lea.vmem [#allocation5], %s481_s27 }
  0x20   : > { %647 = dma.done.wait (%p733_p7), %s188_s28, 32  }
  0x21   : > { %649 = vsyncadd (%p733_p7), %s188_s28, 4294967264  ;;  %v225_v0 = vlaneseq  ;;  %v674_v2 = vmov 0.0   ;;  %v230_v3 = vld [vmem:[%s181_s26] sm:$0xff]  ;;  %vm238_vm1 = vcmask 1043456   ;;  %v231_v25 = vld [vmem:[%s767_s29] sm:$0x3] }
  0x22   : > { %233 = vst [vmem:[#allocation1] ss:$2 sm:$0xff] %v230_v3  ;;  %v287_v33 = vperm.slane %v231_v25, 0  ;;  %v288_v34 = vperm.slane %v231_v25, 1  ;;  %vm342_vm4 = vcmask 1040384   ;;  %p218_p13 = scmp.lt.s32.totalorder %s664_s12, 1 }
  0x23   : > { %vm773_vm0 = vcmp.lt.s32.totalorder %v225_v0, 256  ;;  %v286_v30 = vshrl.u32 %v225_v0, 7  ;;  %vm373_vm5 = vcmask 0  }
  0x24   : > { %229 = vst.msk [vmem:[#allocation2] sm:$0x3] %vm773_vm0, %v674_v2  ;;  %s828_s12 = smov (!%p218_p13, %s664_s12), 1 }
  0x25   : > { %vm289_vm2 = vcmp.eq.s32.totalorder %v286_v30, %v287_v33  ;;  %vm290_vm3 = vcmp.eq.s32.totalorder %v286_v30, %v288_v34  ;;  %s220_s30 = scalar_lea.vmem %s814_s2, %s828_s12 }
  0x29   : > { %v234_v4 = vld.sshfl [vmem:[#allocation1] sm:$0xff pattern:$0x75316420]  ;;  %v235_v5 = vld.sshfl [vmem:[#allocation1 + $0x8] sm:$0xff pattern:$0x75316420] }
  0x2a   : > { %v239_v6 = vsel %vm238_vm1, %v234_v4, -inf  ;;  %v246_v7 = vsel %vm238_vm1, %v235_v5, -inf }
  0x2b   : > { %v240_v8 = vrot.slane %v239_v6, 4  ;;  %v247_v9 = vrot.slane %v246_v7, 4 }
  0x2d   : > { %v241_v10 = vmax.f32 %v239_v6, %v240_v8  ;;  %v248_v11 = vmax.f32 %v246_v7, %v247_v9 }
  0x2f   : > { %v242_v12 = vrot.slane %v241_v10, 2  ;;  %v249_v13 = vrot.slane %v248_v11, 2 }
  0x31   : > { %v243_v14 = vmax.f32 %v241_v10, %v242_v12  ;;  %v250_v15 = vmax.f32 %v248_v11, %v249_v13 }
  0x33   : > { %v244_v16 = vrot.slane %v243_v14, 1  ;;  %v251_v17 = vrot.slane %v250_v15, 1 }
  0x35   : > { %v245_v18 = vmax.f32 %v243_v14, %v244_v16  ;;  %v252_v19 = vmax.f32 %v250_v15, %v251_v17 }
  0x37   : > { %v255_v20 = vrot.slane %v252_v19, 4 }
  0x39   : > { %v256_v21 = vsel %vm238_vm1, %v245_v18, %v255_v20  ;;  %v338_v18 = vld [vmem:[#allocation2] sm:$0x3] }
  0x3a   : > { %v258_v22 = vsub.f32 %v230_v3, %v256_v21 }
  0x3c   : > { %v259_v23 = vmul.f32 1.442695, %v258_v22 }
  0x3e   : > { %548 = vpow2.f32 %v259_v23 }
  0x44   : > { %v549_v24 = vpop.eup %548 }
  0x45   : > { %262 = vst [vmem:[#allocation1] ss:$2 sm:$0xff] %v549_v24 }
  0x4c   : > { %v263_v26 = vld.sshfl [vmem:[#allocation1] sm:$0xff pattern:$0x75316420]  ;;  %v264_v27 = vld.sshfl [vmem:[#allocation1 + $0x8] sm:$0xff pattern:$0x75316420] }
  0x4d   : > { %v267_v28 = vsel %vm238_vm1, %v263_v26, 0.0  ;;  %v274_v29 = vsel %vm238_vm1, %v264_v27, 0.0  ;;  %292 = vst [vmem:[#allocation1] ss:$2 sm:$0xff] %v258_v22 }
  0x4e   : > { %v268_v31 = vrot.slane %v267_v28, 4  ;;  %v275_v32 = vrot.slane %v274_v29, 4 }
  0x50   : > { %v269_v35 = vadd.f32 %v268_v31, %v267_v28  ;;  %v276_v36 = vadd.f32 %v275_v32, %v274_v29 }
  0x52   : > { %v270_v37 = vrot.slane %v269_v35, 2  ;;  %v277_v38 = vrot.slane %v276_v36, 2 }
  0x54   : > { %v271_v39 = vadd.f32 %v270_v37, %v269_v35  ;;  %v278_v40 = vadd.f32 %v277_v38, %v276_v36  ;;  %v293_v41 = vld.sshfl [vmem:[#allocation1] sm:$0xff pattern:$0x75316420]  ;;  %v294_v42 = vld.sshfl [vmem:[#allocation1 + $0x8] sm:$0xff pattern:$0x75316420] }
  0x55   : > { %v297_v43 = vsel %vm289_vm2, %v293_v41, 0.0  ;;  %v298_v44 = vsel %vm290_vm3, %v294_v42, 0.0 }
  0x56   : > { %v272_v45 = vrot.slane %v271_v39, 1  ;;  %v279_v46 = vrot.slane %v278_v40, 1  ;;  %v299_v47 = vsel %vm238_vm1, %v297_v43, 0.0  ;;  %v306_v48 = vsel %vm238_vm1, %v298_v44, 0.0 }
  0x57   : > { %v300_v49 = vrot.slane %v299_v47, 4  ;;  %v307_v50 = vrot.slane %v306_v48, 4 }
  0x58   : > { %v273_v51 = vadd.f32 %v272_v45, %v271_v39  ;;  %v280_v52 = vadd.f32 %v279_v46, %v278_v40 }
  0x59   : > { %v301_v53 = vadd.f32 %v300_v49, %v299_v47  ;;  %v308_v54 = vadd.f32 %v307_v50, %v306_v48 }
  0x5a   : > { %550 = vlog2.f32 %v273_v51 }
  0x5b   : > { %552 = vlog2.f32 %v280_v52  ;;  %v302_v55 = vrot.slane %v301_v53, 2  ;;  %v309_v56 = vrot.slane %v308_v54, 2 }
  0x5d   : > { %v303_v57 = vadd.f32 %v302_v55, %v301_v53  ;;  %v310_v58 = vadd.f32 %v309_v56, %v308_v54 }
  0x5f   : > { %v304_v59 = vrot.slane %v303_v57, 1  ;;  %v311_v60 = vrot.slane %v310_v58, 1 }
  0x60   : > { %v551_v61 = vpop.eup %550 }
  0x61   : > { %v553_v62 = vpop.eup %552  ;;  %v282_v63 = vmul.f32 0.6931472, %v551_v61  ;;  %v305_v0 = vadd.f32 %v304_v59, %v303_v57  ;;  %v312_v2 = vadd.f32 %v311_v60, %v310_v58 }
  0x62   : > { %v284_v3 = vmul.f32 0.6931472, %v553_v62 }
  0x63   : > { %v313_v4 = vsub.f32 %v305_v0, %v282_v63 }
  0x64   : > { %v314_v5 = vsub.f32 %v312_v2, %v284_v3 }
  0x65   : > { %v315_v6 = vmul.f32 1.442695, %v313_v4 }
  0x66   : > { %v317_v7 = vmul.f32 1.442695, %v314_v5 }
  0x67   : > { %554 = vpow2.f32 %v315_v6 }
  0x68   : > { %556 = vpow2.f32 %v317_v7 }
  0x6d   : > { %v555_v8 = vpop.eup %554 }
  0x6e   : > { %v557_v9 = vpop.eup %556  ;;  %v319_v10 = vsub.f32 1.0, %v555_v8 }
  0x6f   : > { %v320_v11 = vsub.f32 1.0, %v557_v9 }
  0x70   : > { %v321_v12 = vmul.f32 %v319_v10, %v319_v10 }
  0x71   : > { %v322_v13 = vmul.f32 %v320_v11, %v320_v11 }
  0x72   : > { %v323_v14 = vsub.f32 0.0, %v321_v12 }
  0x73   : > { %v324_v15 = vsub.f32 0.0, %v322_v13 }
  0x74   : > { %v325_v16 = vmul.f32 %v323_v14, %v313_v4 }
  0x75   : > { %v326_v17 = vmul.f32 %v324_v15, %v314_v5 }
  0x77   : > { %v341_v19 = vrot.slane %v326_v17, 7 }
  0x79   : > { %v343_v20 = vsel %vm342_vm4, %v325_v16, %v341_v19 }
  0x7a   : > { %v345_v21 = vadd.f32 %v343_v20, %v338_v18 }
  0x7c   : > { %350 = vst.msk [vmem:[#allocation2] sm:$0x3] %vm773_vm0, %v345_v21 }
  0x83   : > { %v354_v22 = vld [vmem:[#allocation2] sm:$0x3] }
  0x84   : > { %v356_v23 = vperm.slane %v354_v22, 0  ;;  %v357_v24 = vperm.slane %v354_v22, 1 }
  0x86   : > { %v360_v25 = vsel %vm342_vm4, %v356_v23, 0.0  ;;  %v361_v26 = vsel %vm342_vm4, %v357_v24, 0.0 }
  0x87   : > { %v362_v27 = vadd.f32 %v361_v26, %v360_v25 }
  0x89   : > { %363 = vadd.xlane.f32.xlu0 %v362_v27 }
  0xfc   : > { %v364_v28 = vpop.xlane.xlu0 %363 }
  0xfd   : > { %v365_v29 = vrot.slane %v364_v28, 4 }
  0xff   : > { %v366_v30 = vadd.f32 %v365_v29, %v364_v28 }
 0x101   : > { %v367_v31 = vrot.slane %v366_v30, 2 }
 0x103   : > { %v368_v32 = vadd.f32 %v367_v31, %v366_v30 }
 0x105   : > { %v369_v33 = vrot.slane %v368_v32, 1 }
 0x107   : > { %v370_v34 = vadd.f32 %v369_v33, %v368_v32 }
 0x109   : > { %485 = vpush %v370_v34 }
 0x13a   : > { %s486_s3 = spop %485 }
 0x13b   : > { %v372_v1 = vstv %s486_s3 }
 0x13c   : > { %374 = vst.msk [vmem:[%s220_s30] sm:$0x1] %vm373_vm5, %v372_v1 }
 0x13d PF: > { %s18_s14 = sadd.s32 1, %s672_s14   ;;  %s820_s9 = smov %s656_s10 }
 0x13e   : > { %p15_p0 = scmp.ge.s32.totalorder %s18_s14, 4   ;;  %s821_s10 = smov %s660_s11 }
 0x13f   : > { %s822_s11 = smov %s739_s21  ;;  %s823_s12 = smov %s668_s13 }
 0x140   : > { %s824_s13 = smov %s826_s16  ;;  %17 = sbr.rel (!%p15_p0) target bundleno = 6 (0x6), region = 89 }
 0x145   :  { %392 = vsyncpa [#allocation4], 1 }
 0x146   :  { %394 = vsyncpa [#allocation4 + $0x1], 1 }
 0x147   :  { %395 = vsyncpa [#allocation6], 1 }
 0x148   :  { %397 = vsyncpa [#allocation6 + $0x1], 1 }

</bundles_post_ra>
